<compile_context>
chip_gen: v7x
topology: tpu7x:2x2x1
jax: 0.10.0
libtpu: 0.0.40
codegen_flags: <defaults>
</compile_context>

<pallas_src>
import functools

import jax
import jax.numpy as jnp
from jax import lax
from jax.experimental import pallas as pl
from jax.experimental.pallas import tpu as pltpu


def _round_up(x, m):
    return (x + m - 1) // m * m


def _cdiv(a, b):
    return -(-a // b)


_VMEM_LIMIT = 48 * 1024 * 1024     # explicit limit: safe on v7x (64 MiB physical) and v5e/v6e
_TILE_BUDGET = 40 * 1024 * 1024    # target live footprint (double-buffered tiles + weights)


def _tile_bytes(tm, ck, c_out, in_bytes):
    # double-buffered patches tile + double-buffered f32 output tile + resident weights + slack
    return 2 * tm * ck * in_bytes + 2 * tm * c_out * 4 + ck * c_out * in_bytes + (1 << 16)


def _conv_stats_kernel(patches_ref, w_ref, s1_ref, s2_ref):
    """Per M-tile: conv matmul (f32 accumulate) + per-channel PARTIAL sum / sum-of-squares.

    Each grid step writes its own (8, C_out) partial block (rows are a sublane-broadcast of the
    per-channel totals), so no output block is revisited and the grid axis stays "parallel".
    """
    y = jnp.dot(patches_ref[...], w_ref[...], preferred_element_type=jnp.float32)
    c = y.shape[1]
    s1_ref[...] = jnp.broadcast_to(jnp.sum(y, axis=0, keepdims=True), (8, c))
    s2_ref[...] = jnp.broadcast_to(jnp.sum(y * y, axis=0, keepdims=True), (8, c))


def _conv_norm_lrelu_kernel(patches_ref, w_ref, scale_ref, shift_ref, o_ref, *,
                            negative_slope):
    """Per M-tile: recompute conv matmul, folded BatchNorm FMA, LeakyReLU, single store."""
    y = jnp.dot(patches_ref[...], w_ref[...], preferred_element_type=jnp.float32)
    z = y * scale_ref[...] + shift_ref[...]
    o_ref[...] = jnp.where(z >= 0, z, negative_slope * z)


@functools.partial(
    jax.jit,
    static_argnames=("stride", "padding", "eps", "negative_slope", "compute_dtype", "tm"))
def conv_norm_relu(x, weight, bias, gamma, beta, *, stride, padding,
                   eps=1e-5, negative_slope=0.2,
                   compute_dtype=jnp.bfloat16, tm=4096):
    """x: (N, C_in, L) f32 -> (N, C_out, L_out) f32. Conv1d + BatchNorm1d(train) + LeakyReLU."""
    # A per-channel constant added before training-mode BatchNorm is exactly cancelled by the
    # mean subtraction, so the conv bias never needs to be applied.
    del bias

    N, C_in, L = x.shape
    C_out, C_in_w, K = weight.shape
    assert C_in_w == C_in

    L_out = (L + 2 * padding - K) // stride + 1
    M = N * L_out
    CK = C_in * K
    in_bytes = jnp.dtype(compute_dtype).itemsize

    # ---- glue: im2col from K strided slices (no gather); cast to compute dtype FIRST so the
    #      stacked intermediate and the (M, CK) patches stream are narrow, not f32. ----
    xp = jnp.pad(x, ((0, 0), (0, 0), (padding, padding))).astype(compute_dtype)
    span = (L_out - 1) * stride + 1
    cols = [lax.slice(xp, (0, 0, k), (N, C_in, k + span), (1, 1, stride))
            for k in range(K)]                                   # K x (N, C_in, L_out)
    patches = jnp.stack(cols, axis=3)                            # (N, C_in, L_out, K)
    patches = jnp.transpose(patches, (0, 2, 1, 3)).reshape(M, CK)

    # ---- tile selection: large M-tiles (amortize per-step overhead), clamped to the VMEM
    #      budget, with a mild preference for an even tile count (v7x: 2 TensorCores). ----
    tm_eff = min(_round_up(tm, 8), _round_up(M, 8))
    while tm_eff > 8 and _tile_bytes(tm_eff, CK, C_out, in_bytes) > _TILE_BUDGET:
        tm_eff = max(8, _round_up(tm_eff // 2, 8))
    n_tiles = _cdiv(M, tm_eff)
    if n_tiles > 1 and n_tiles % 2 == 1:
        cand = _round_up(_cdiv(M, n_tiles + 1), 8)
        if cand >= 8 and _cdiv(M, cand) % 2 == 0:
            tm_eff = cand
            n_tiles = _cdiv(M, tm_eff)
    M_pad = n_tiles * tm_eff

    patches_p = jnp.pad(patches, ((0, M_pad - M), (0, 0)))       # zero rows: no effect on stats
    w2 = weight.reshape(C_out, CK).T.astype(compute_dtype)       # (CK, C_out) tiny & resident

    cparams = pltpu.CompilerParams(dimension_semantics=("parallel",),
                                   vmem_limit_bytes=_VMEM_LIMIT)

    # ---- pass A: BN statistics only (no (M, C) intermediate ever touches HBM) ----
    s1p, s2p = pl.pallas_call(
        _conv_stats_kernel,
        out_shape=(jax.ShapeDtypeStruct((n_tiles, 8, C_out), jnp.float32),
                   jax.ShapeDtypeStruct((n_tiles, 8, C_out), jnp.float32)),
        grid=(n_tiles,),
        in_specs=[pl.BlockSpec((tm_eff, CK), lambda i: (i, 0)),
                  pl.BlockSpec((CK, C_out), lambda i: (0, 0))],
        out_specs=(pl.BlockSpec((None, 8, C_out), lambda i: (i, 0, 0)),
                   pl.BlockSpec((None, 8, C_out), lambda i: (i, 0, 0))),
        compiler_params=cparams,
    )(patches_p, w2)

    # ---- fold BN (training-mode biased stats over the true M rows) into one per-channel FMA.
    # TODO(synk): E[x^2]-E[x]^2 in f32 can cancel for very large M / large-mean activations;
    #             switch to a shifted / two-pass variance if that regime shows up.
    inv_m = jnp.float32(1.0 / M)
    s1 = jnp.sum(s1p[:, 0, :], axis=0)                           # (C_out,)
    s2 = jnp.sum(s2p[:, 0, :], axis=0)                           # (C_out,)
    mean = s1 * inv_m
    var = jnp.maximum(s2 * inv_m - mean * mean, 0.0)             # biased variance, f32
    scale = (gamma.astype(jnp.float32) * lax.rsqrt(var + eps))[None, :]   # (1, C_out)
    shift = beta.astype(jnp.float32)[None, :] - mean[None, :] * scale     # (1, C_out)

    # ---- pass B: recompute conv + normalize + LeakyReLU; store only the true C_out lanes ----
    out = pl.pallas_call(
        functools.partial(_conv_norm_lrelu_kernel, negative_slope=negative_slope),
        out_shape=jax.ShapeDtypeStruct((M_pad, C_out), jnp.float32),
        grid=(n_tiles,),
        in_specs=[pl.BlockSpec((tm_eff, CK), lambda i: (i, 0)),
                  pl.BlockSpec((CK, C_out), lambda i: (0, 0)),
                  pl.BlockSpec((1, C_out), lambda i: (0, 0)),
                  pl.BlockSpec((1, C_out), lambda i: (0, 0))],
        out_specs=pl.BlockSpec((tm_eff, C_out), lambda i: (i, 0)),
        compiler_params=cparams,
    )(patches_p, w2, scale, shift)

    # ---- glue: drop M padding, back to NCL (see TODO above about NLC consumers) ----
    return jnp.transpose(out[:M].reshape(N, L_out, C_out), (0, 2, 1))


def _reference(x, weight, bias, gamma, beta, *, stride, padding,
               eps=1e-5, negative_slope=0.2):
    y = lax.conv_general_dilated(
        x, weight, window_strides=(stride,), padding=[(padding, padding)],
        dimension_numbers=("NCH", "OIH", "NCH"))
    y = y + bias[None, :, None]
    mean = jnp.mean(y, axis=(0, 2), keepdims=True)
    var = jnp.mean((y - mean) ** 2, axis=(0, 2), keepdims=True)
    yn = (y - mean) / jnp.sqrt(var + eps)
    yn = yn * gamma[None, :, None] + beta[None, :, None]
    return jnp.where(yn >= 0, yn, negative_slope * yn)


if __name__ == "__main__":
    def run_case(key, *, N, C_in, L, C_out, K, stride, padding, tm):
        kx, kw, kb = jax.random.split(key, 3)
        x = jax.random.normal(kx, (N, C_in, L), dtype=jnp.float32)
        bound = 1.0 / (C_in * K) ** 0.5
        weight = jax.random.uniform(kw, (C_out, C_in, K), jnp.float32, -bound, bound)
        bias = jax.random.uniform(kb, (C_out,), jnp.float32, -bound, bound)
        gamma = jnp.full((C_out,), 1.1, jnp.float32)
        beta = jnp.full((C_out,), 0.05, jnp.float32)

        ref = _reference(x, weight, bias, gamma, beta, stride=stride, padding=padding)
        L_out = (L + 2 * padding - K) // stride + 1
        assert ref.shape == (N, C_out, L_out)

        # Production path: bf16 MXU operands, f32 stats (looser tol from operand rounding).
        out_bf16 = jax.block_until_ready(
            conv_norm_relu(x, weight, bias, gamma, beta, stride=stride, padding=padding,
                           compute_dtype=jnp.bfloat16, tm=tm))
        assert out_bf16.shape == ref.shape
        assert jnp.allclose(out_bf16, ref, atol=5e-2, rtol=5e-2)

        # f32 path: tight tolerance check of the exact fused semantics.
        out_f32 = jax.block_until_ready(
            conv_norm_relu(x, weight, bias, gamma, beta, stride=stride, padding=padding,
                           compute_dtype=jnp.float32, tm=tm))
        assert jnp.allclose(out_f32, ref, atol=1e-4, rtol=1e-4)

    key = jax.random.PRNGKey(0)
    k1, k2 = jax.random.split(key)
    # Case 1: Conv1d(4 -> 8, k=3, s=1, p=1), single M-tile, default big-tile path.
    run_case(k1, N=2, C_in=4, L=16, C_out=8, K=3, stride=1, padding=1, tm=4096)
    # Case 2: Conv1d(6 -> 16, k=5, s=2, p=2), tiny tm to exercise multi-tile partial stats,
    # M padding, and the parallel recompute pass.
    run_case(k2, N=3, C_in=6, L=20, C_out=16, K=5, stride=2, padding=2, tm=8)

    print("KERNEL_OK")
</pallas_src>

<mosaic_0001>
module attributes {stable_mosaic.version = 11 : i64} {
  func.func @_conv_stats_kernel(%arg0: i32, %arg1: memref<32x12xbf16, #tpu.memory_space<vmem>>, %arg2: memref<12x8xbf16, #tpu.memory_space<vmem>>, %arg3: memref<1x8x8xf32, #tpu.memory_space<vmem>>, %arg4: memref<1x8x8xf32, #tpu.memory_space<vmem>>) attributes {dimension_semantics = [#tpu.dimension_semantics<parallel>], iteration_bounds = array<i64: 1>, scalar_prefetch = 0 : i64, scratch_operands = 0 : i64, tpu.core_type = #tpu.core_type<tc>, window_params = [{transform_indices = @transform_0, window_bounds = array<i64: 32, 12>}, {pipeline_mode = #tpu.pipeline_mode<synchronous>, transform_indices = @transform_1, window_bounds = array<i64: 12, 8>}, {transform_indices = @transform_2, window_bounds = array<i64: 1, 8, 8>}, {transform_indices = @transform_3, window_bounds = array<i64: 1, 8, 8>}]} {
    %c0 = arith.constant 0 : index
    %c0_0 = arith.constant 0 : index
    %0 = vector.load %arg1[%c0, %c0_0] : memref<32x12xbf16, #tpu.memory_space<vmem>>, vector<32x12xbf16>
    %c0_1 = arith.constant 0 : index
    %c0_2 = arith.constant 0 : index
    %1 = vector.load %arg2[%c0_1, %c0_2] : memref<12x8xbf16, #tpu.memory_space<vmem>>, vector<12x8xbf16>
    %cst = arith.constant dense<0.000000e+00> : vector<32x8xf32>
    %2 = tpu.matmul %0, %1, %cst {dimension_numbers = #tpu.dot_dimension_numbers<[1], [0], [0], [1], [0, 0, 1, 1], [], []>} : vector<32x12xbf16>, vector<12x8xbf16>, vector<32x8xf32> -> vector<32x8xf32>
    %cst_3 = arith.constant dense<0.000000e+00> : vector<8xf32>
    %3 = vector.multi_reduction <add>, %2, %cst_3 [0] : vector<32x8xf32> to vector<8xf32>
    %4 = vector.shape_cast %3 : vector<8xf32> to vector<1x8xf32>
    %5 = vector.shape_cast %4 : vector<1x8xf32> to vector<1x8xf32>
    %6 = vector.broadcast %5 : vector<1x8xf32> to vector<8x8xf32>
    %c0_4 = arith.constant 0 : index
    %c0_5 = arith.constant 0 : index
    %c0_6 = arith.constant 0 : index
    %7 = vector.load %arg3[%c0_4, %c0_5, %c0_6] : memref<1x8x8xf32, #tpu.memory_space<vmem>>, vector<1x8x8xf32>
    %8 = vector.shape_cast %7 : vector<1x8x8xf32> to vector<8x8xf32>
    %9 = vector.shape_cast %6 : vector<8x8xf32> to vector<1x8x8xf32>
    tpu.vector_store %arg3[%c0_4, %c0_5, %c0_6], %9 {strides = array<i32>} : memref<1x8x8xf32, #tpu.memory_space<vmem>>, vector<1x8x8xf32>,
    %10 = arith.mulf %2, %2 : vector<32x8xf32>
    %cst_7 = arith.constant dense<0.000000e+00> : vector<8xf32>
    %11 = vector.multi_reduction <add>, %10, %cst_7 [0] : vector<32x8xf32> to vector<8xf32>
    %12 = vector.shape_cast %11 : vector<8xf32> to vector<1x8xf32>
    %13 = vector.shape_cast %12 : vector<1x8xf32> to vector<1x8xf32>
    %14 = vector.broadcast %13 : vector<1x8xf32> to vector<8x8xf32>
    %c0_8 = arith.constant 0 : index
    %c0_9 = arith.constant 0 : index
    %c0_10 = arith.constant 0 : index
    %15 = vector.load %arg4[%c0_8, %c0_9, %c0_10] : memref<1x8x8xf32, #tpu.memory_space<vmem>>, vector<1x8x8xf32>
    %16 = vector.shape_cast %15 : vector<1x8x8xf32> to vector<8x8xf32>
    %17 = vector.shape_cast %14 : vector<8x8xf32> to vector<1x8x8xf32>
    tpu.vector_store %arg4[%c0_8, %c0_9, %c0_10], %17 {strides = array<i32>} : memref<1x8x8xf32, #tpu.memory_space<vmem>>, vector<1x8x8xf32>,
    return
  }
  func.func @transform_0(%arg0: i32) -> (i32, i32) {
    %c0_i32 = arith.constant 0 : i32
    %c0_i32_0 = arith.constant 0 : i32
    return %arg0, %c0_i32 : i32, i32
  }
  func.func @transform_1(%arg0: i32) -> (i32, i32) {
    %c0_i32 = arith.constant 0 : i32
    %c0_i32_0 = arith.constant 0 : i32
    %c0_i32_1 = arith.constant 0 : i32
    return %c0_i32, %c0_i32_0 : i32, i32
  }
  func.func @transform_2(%arg0: i32) -> (i32, i32, i32) {
    %c0_i32 = arith.constant 0 : i32
    %c0_i32_0 = arith.constant 0 : i32
    %c0_i32_1 = arith.constant 0 : i32
    return %arg0, %c0_i32, %c0_i32_0 : i32, i32, i32
  }
  func.func @transform_3(%arg0: i32) -> (i32, i32, i32) {
    %c0_i32 = arith.constant 0 : i32
    %c0_i32_0 = arith.constant 0 : i32
    %c0_i32_1 = arith.constant 0 : i32
    return %arg0, %c0_i32, %c0_i32_0 : i32, i32, i32
  }
}

module attributes {stable_mosaic.version = 11 : i64} {
  func.func @_conv_norm_lrelu_kernel(%arg0: i32, %arg1: memref<32x12xbf16, #tpu.memory_space<vmem>>, %arg2: memref<12x8xbf16, #tpu.memory_space<vmem>>, %arg3: memref<1x8xf32, #tpu.memory_space<vmem>>, %arg4: memref<1x8xf32, #tpu.memory_space<vmem>>, %arg5: memref<32x8xf32, #tpu.memory_space<vmem>>) attributes {dimension_semantics = [#tpu.dimension_semantics<parallel>], iteration_bounds = array<i64: 1>, scalar_prefetch = 0 : i64, scratch_operands = 0 : i64, tpu.core_type = #tpu.core_type<tc>, window_params = [{transform_indices = @transform_0, window_bounds = array<i64: 32, 12>}, {pipeline_mode = #tpu.pipeline_mode<synchronous>, transform_indices = @transform_1, window_bounds = array<i64: 12, 8>}, {pipeline_mode = #tpu.pipeline_mode<synchronous>, transform_indices = @transform_2, window_bounds = array<i64: 1, 8>}, {pipeline_mode = #tpu.pipeline_mode<synchronous>, transform_indices = @transform_3, window_bounds = array<i64: 1, 8>}, {transform_indices = @transform_4, window_bounds = array<i64: 32, 8>}]} {
    %c0 = arith.constant 0 : index
    %c0_0 = arith.constant 0 : index
    %0 = vector.load %arg1[%c0, %c0_0] : memref<32x12xbf16, #tpu.memory_space<vmem>>, vector<32x12xbf16>
    %c0_1 = arith.constant 0 : index
    %c0_2 = arith.constant 0 : index
    %1 = vector.load %arg2[%c0_1, %c0_2] : memref<12x8xbf16, #tpu.memory_space<vmem>>, vector<12x8xbf16>
    %cst = arith.constant dense<0.000000e+00> : vector<32x8xf32>
    %2 = tpu.matmul %0, %1, %cst {dimension_numbers = #tpu.dot_dimension_numbers<[1], [0], [0], [1], [0, 0, 1, 1], [], []>} : vector<32x12xbf16>, vector<12x8xbf16>, vector<32x8xf32> -> vector<32x8xf32>
    %c0_3 = arith.constant 0 : index
    %c0_4 = arith.constant 0 : index
    %3 = vector.load %arg3[%c0_3, %c0_4] : memref<1x8xf32, #tpu.memory_space<vmem>>, vector<1x8xf32>
    %4 = vector.broadcast %3 : vector<1x8xf32> to vector<32x8xf32>
    %5 = arith.mulf %2, %4 : vector<32x8xf32>
    %c0_5 = arith.constant 0 : index
    %c0_6 = arith.constant 0 : index
    %6 = vector.load %arg4[%c0_5, %c0_6] : memref<1x8xf32, #tpu.memory_space<vmem>>, vector<1x8xf32>
    %7 = vector.broadcast %6 : vector<1x8xf32> to vector<32x8xf32>
    %8 = arith.addf %5, %7 : vector<32x8xf32>
    %cst_7 = arith.constant 0.000000e+00 : f32
    %9 = vector.broadcast %cst_7 : f32 to vector<32x8xf32>
    %10 = arith.cmpf oge, %8, %9 : vector<32x8xf32>
    %cst_8 = arith.constant 2.000000e-01 : f32
    %11 = vector.broadcast %cst_8 : f32 to vector<32x8xf32>
    %12 = arith.mulf %11, %8 : vector<32x8xf32>
    %13 = arith.select %10, %8, %12 : vector<32x8xi1>, vector<32x8xf32>
    %c0_9 = arith.constant 0 : index
    %c0_10 = arith.constant 0 : index
    %14 = vector.load %arg5[%c0_9, %c0_10] : memref<32x8xf32, #tpu.memory_space<vmem>>, vector<32x8xf32>
    tpu.vector_store %arg5[%c0_9, %c0_10], %13 {strides = array<i32>} : memref<32x8xf32, #tpu.memory_space<vmem>>, vector<32x8xf32>,
    return
  }
  func.func @transform_0(%arg0: i32) -> (i32, i32) {
    %c0_i32 = arith.constant 0 : i32
    %c0_i32_0 = arith.constant 0 : i32
    return %arg0, %c0_i32 : i32, i32
  }
  func.func @transform_1(%arg0: i32) -> (i32, i32) {
    %c0_i32 = arith.constant 0 : i32
    %c0_i32_0 = arith.constant 0 : i32
    %c0_i32_1 = arith.constant 0 : i32
    return %c0_i32, %c0_i32_0 : i32, i32
  }
  func.func @transform_2(%arg0: i32) -> (i32, i32) {
    %c0_i32 = arith.constant 0 : i32
    %c0_i32_0 = arith.constant 0 : i32
    %c0_i32_1 = arith.constant 0 : i32
    return %c0_i32, %c0_i32_0 : i32, i32
  }
  func.func @transform_3(%arg0: i32) -> (i32, i32) {
    %c0_i32 = arith.constant 0 : i32
    %c0_i32_0 = arith.constant 0 : i32
    %c0_i32_1 = arith.constant 0 : i32
    return %c0_i32, %c0_i32_0 : i32, i32
  }
  func.func @transform_4(%arg0: i32) -> (i32, i32) {
    %c0_i32 = arith.constant 0 : i32
    %c0_i32_0 = arith.constant 0 : i32
    return %arg0, %c0_i32 : i32, i32
  }
}

</mosaic_0001>

<bundles_post_ra>
// kernel: conv_norm_relu.2
= control target key start
LH: loop header
LB: loop body
LE: loop exit
PB: predicated region body
PF: predicated region fallthrough
CT: control target
= control target key end

     0   :  { %vm42_vm0 = vcmask 1045504   ;;  %vm35_vm1 = vcmask 97280   ;;  %vm95_vm2 = vcmask 64512   ;;  %s199_s1 = inlined_call_operand.vmem [shape: bf16[12,8], index: 1, kind: input, shape index: {}]   ;;  %s200_s0 = inlined_call_operand.vmem [shape: bf16[32,12], index: 0, kind: input, shape index: {}]   ;;  %s201_s2 = inlined_call_operand.vmem [shape: f32[1,8,8], index: 2, kind: output, shape index: {0}]   ;;  %s202_s3 = inlined_call_operand.vmem [shape: f32[1,8,8], index: 3, kind: output, shape index: {1}]  }
   0x1   :  { %v151_v0 = vld [vmem:[%s199_s1] sm:$0x3f]   ;;  %v153_v3 = vld [vmem:[%s200_s0 + $0x8] sm:$0xff]  }
   0x2   :  { %v152_v1 = vld [vmem:[%s200_s0] sm:$0xff]   ;;  %150 = vmatprep.subr.msk.bf16.mxu0 %vm42_vm0, %v151_v0  ;;  %v44_v2 = vsel %vm42_vm0, %v151_v0, 0 }
   0x3   :  { %145 = vmatpush3.bf16.msra.mxu0 %v44_v2  ;;  %146 = vmatprep.mubr.msk.bf16.mxu0 %vm35_vm1, %v152_v1 }
   0x6   :  { %147 = vmatmul.mubr.msk.bf16.vlgmr.msra.gmra.mrb[0].mxu0 %vm35_vm1, %v153_v3 }
  0xd9   :  { %v148_v4 = vpop.f32.mrb[0].mxu0 }
  0xda   :  { %v80_v5 = vpop.f32.mrb[1].mxu0  ;;  %v112_v9 = vmul.f32 %v148_v4, %v148_v4  ;;  %v99_v14 = vsel %vm95_vm2, %v148_v4, 0.0 }
  0xdb   :  { %v110_v6 = vmul.f32 %v80_v5, %v80_v5  ;;  %v149_v7 = vpop.f32.mrb[2].mxu0  ;;  %v96_v10 = vsel %vm95_vm2, %v80_v5, 0.0 }
  0xdc   :  { %v83_v8 = vpop.f32.mrb[3].mxu0  ;;  %v113_v16 = vmul.f32 %v149_v7, %v149_v7  ;;  %v117_v20 = vsel %vm95_vm2, %v112_v9, 0.0  ;;  %v101_v21 = vsel %vm95_vm2, %v149_v7, 0.0 }
  0xdd   :  { %v97_v11 = vsel %vm95_vm2, %v83_v8, 0.0  ;;  %v111_v12 = vmul.f32 %v83_v8, %v83_v8  ;;  %v114_v15 = vsel %vm95_vm2, %v110_v6, 0.0 }
  0xde   :  { %v98_v13 = vadd.f32 %v97_v11, %v96_v10  ;;  %v119_v24 = vsel %vm95_vm2, %v113_v16, 0.0 }
  0xdf   :  { %v115_v17 = vsel %vm95_vm2, %v111_v12, 0.0 }
  0xe0   :  { %v100_v18 = vadd.f32 %v99_v14, %v98_v13  ;;  %v116_v19 = vadd.f32 %v115_v17, %v114_v15 }
  0xe2   :  { %v102_v22 = vadd.f32 %v101_v21, %v100_v18  ;;  %v118_v23 = vadd.f32 %v117_v20, %v116_v19 }
  0xe4   :  { %v103_v25 = vrot.slane %v102_v22, 4  ;;  %v120_v26 = vadd.f32 %v119_v24, %v118_v23 }
  0xe6   :  { %v104_v27 = vadd.f32 %v103_v25, %v102_v22  ;;  %v121_v28 = vrot.slane %v120_v26, 4 }
  0xe8   :  { %v105_v29 = vrot.slane %v104_v27, 2  ;;  %v122_v30 = vadd.f32 %v121_v28, %v120_v26 }
  0xea   :  { %v106_v31 = vadd.f32 %v105_v29, %v104_v27  ;;  %v123_v32 = vrot.slane %v122_v30, 2 }
  0xec   :  { %v107_v33 = vrot.slane %v106_v31, 1  ;;  %v124_v34 = vadd.f32 %v123_v32, %v122_v30 }
  0xee   :  { %v108_v35 = vadd.f32 %v107_v33, %v106_v31  ;;  %v125_v36 = vrot.slane %v124_v34, 1 }
  0xf0   :  { %109 = vst.msk [vmem:[%s201_s2] sm:$0xff] %vm95_vm2, %v108_v35  ;;  %v126_v37 = vadd.f32 %v125_v36, %v124_v34 }
  0xf2   :  { %127 = vst.msk [vmem:[%s202_s3] sm:$0xff] %vm95_vm2, %v126_v37 }

// kernel: conv_norm_relu.3
= control target key start
LH: loop header
LB: loop body
LE: loop exit
PB: predicated region body
PF: predicated region fallthrough
CT: control target
= control target key end

     0   :  { %vm46_vm0 = vcmask 1045504   ;;  %vm39_vm1 = vcmask 97280   ;;  %vm133_vm3 = vcmask 64512   ;;  %s218_s1 = inlined_call_operand.vmem [shape: bf16[12,8], index: 1, kind: input, shape index: {}]   ;;  %s219_s0 = inlined_call_operand.vmem [shape: bf16[32,12], index: 0, kind: input, shape index: {}]   ;;  %s220_s2 = inlined_call_operand.vmem [shape: f32[1,8], index: 2, kind: input, shape index: {}]   ;;  %s221_s3 = inlined_call_operand.vmem [shape: f32[1,8], index: 3, kind: input, shape index: {}]   ;;  %s222_s4 = inlined_call_operand.vmem [shape: f32[32,8], index: 4, kind: output, shape index: {}]  }
   0x1   :  { %v159_v0 = vld [vmem:[%s218_s1] sm:$0x3f]   ;;  %v161_v3 = vld [vmem:[%s219_s0 + $0x8] sm:$0xff]  }
   0x2   :  { %v160_v1 = vld [vmem:[%s219_s0] sm:$0xff]   ;;  %158 = vmatprep.subr.msk.bf16.mxu0 %vm46_vm0, %v159_v0  ;;  %v48_v2 = vsel %vm46_vm0, %v159_v0, 0 }
   0x3   :  { %153 = vmatpush3.bf16.msra.mxu0 %v48_v2  ;;  %154 = vmatprep.mubr.msk.bf16.mxu0 %vm39_vm1, %v160_v1  ;;  %v147_v4 = vld [vmem:[%s220_s2] ss:$0 sm:$0xff] }
   0x4   :  { %v148_v6 = vld [vmem:[%s221_s3] ss:$0 sm:$0xff] }
   0x6   :  { %155 = vmatmul.mubr.msk.bf16.vlgmr.msra.gmra.mrb[0].mxu0 %vm39_vm1, %v161_v3 }
  0xd9   :  { %v156_v5 = vpop.f32.mrb[0].mxu0 }
  0xda   :  { %v108_v7 = vmul.f32 %v156_v5, %v147_v4  ;;  %v84_v8 = vpop.f32.mrb[1].mxu0 }
  0xdb   :  { %v106_v9 = vmul.f32 %v147_v4, %v84_v8  ;;  %v157_v10 = vpop.f32.mrb[2].mxu0 }
  0xdc   :  { %v119_v11 = vadd.f32 %v148_v6, %v108_v7  ;;  %v109_v12 = vmul.f32 %v157_v10, %v147_v4  ;;  %v87_v13 = vpop.f32.mrb[3].mxu0 }
  0xdd   :  { %v117_v14 = vadd.f32 %v148_v6, %v106_v9  ;;  %v107_v15 = vmul.f32 %v147_v4, %v87_v13 }
  0xde   :  { %vm123_vm2 = vcmp.ge.f32.partialorder %v119_v11, 0.0  ;;  %v127_v16 = vmul.f32 0.2, %v119_v11  ;;  %v120_v17 = vadd.f32 %v148_v6, %v109_v12 }
  0xdf   :  { %vm121_vm4 = vcmp.ge.f32.partialorder %v117_v14, 0.0  ;;  %v125_v18 = vmul.f32 0.2, %v117_v14  ;;  %v118_v19 = vadd.f32 %v148_v6, %v107_v15 }
  0xe0   :  { %v131_v20 = vsel %vm123_vm2, %v119_v11, %v127_v16  ;;  %vm124_vm5 = vcmp.ge.f32.partialorder %v120_v17, 0.0  ;;  %v128_v21 = vmul.f32 0.2, %v120_v17 }
  0xe1   :  { %136 = vst.msk [vmem:[%s222_s4 + $0x10] sm:$0xff] %vm133_vm3, %v131_v20  ;;  %v129_v22 = vsel %vm121_vm4, %v117_v14, %v125_v18  ;;  %vm122_vm6 = vcmp.ge.f32.partialorder %v118_v19, 0.0  ;;  %v126_v23 = vmul.f32 0.2, %v118_v19 }
  0xe2   :  { %134 = vst.msk [vmem:[%s222_s4] sm:$0xff] %vm133_vm3, %v129_v22  ;;  %v132_v24 = vsel %vm124_vm5, %v120_v17, %v128_v21 }
  0xe3   :  { %137 = vst.msk [vmem:[%s222_s4 + $0x18] sm:$0xff] %vm133_vm3, %v132_v24  ;;  %v130_v25 = vsel %vm122_vm6, %v118_v19, %v126_v23 }
  0xe4   :  { %135 = vst.msk [vmem:[%s222_s4 + $0x8] sm:$0xff] %vm133_vm3, %v130_v25 }

</bundles_post_ra>
